<compile_context>
chip_gen: v6e
topology: v6e:2x2x1
jax: 0.10.0
libtpu: 0.0.40
codegen_flags: <defaults>
</compile_context>

<pallas_src>
import functools
import math

import jax
import jax.numpy as jnp
from jax.experimental import pallas as pl
from jax.experimental.pallas import tpu as pltpu

LANES = 128
SUBLANES = 8
TARGET_BLOCK_BYTES = 4 * 1024 * 1024   # ~4 MiB per input block (x2 inputs x2 buffers)
MAX_ACC_ROWS = 64                      # partial-accumulator height (multiple of 8)
VMEM_LIMIT_BYTES = 48 * 1024 * 1024


def _round_up(x, m):
    return ((x + m - 1) // m) * m


def _dice_kernel(pred_ref, target_ref, inter_ref, sum_ref, *,
                 tile_rows, valid_rows, blocks_per_core, full_blocks,
                 acc_rows, any_masked):
    c = pl.program_id(0)           # TensorCore shard ("parallel")
    i = pl.program_id(1)           # row-block within this shard ("arbitrary")
    gb = c * blocks_per_core + i   # logical (unclamped) row-block index

    @pl.when(i == 0)
    def _():
        inter_ref[...] = jnp.zeros_like(inter_ref)
        sum_ref[...] = jnp.zeros_like(sum_ref)

    def accumulate(p, t):
        # Fold (tile_rows,128) -> (acc_rows,128): wide partials = many independent
        # VPU add chains; the single cross-lane reduce happens in the JAX wrapper.
        inter_ref[...] += jnp.sum((p * t).reshape(-1, acc_rows, LANES), axis=0)
        sum_ref[...] += jnp.sum((p + t).reshape(-1, acc_rows, LANES), axis=0)

    if not any_masked:
        accumulate(pred_ref[...].astype(jnp.float32),
                   target_ref[...].astype(jnp.float32))
    else:
        @pl.when(gb < full_blocks)           # hot path: zero masking ops
        def _():
            accumulate(pred_ref[...].astype(jnp.float32),
                       target_ref[...].astype(jnp.float32))

        @pl.when(gb >= full_blocks)          # ragged / overflow blocks only
        def _():
            p = pred_ref[...].astype(jnp.float32)
            t = target_ref[...].astype(jnp.float32)
            row = gb * tile_rows + jax.lax.broadcasted_iota(jnp.int32, p.shape, 0)
            valid = row < valid_rows
            # Mask BEFORE any arithmetic: OOB block contents are unspecified.
            accumulate(jnp.where(valid, p, 0.0), jnp.where(valid, t, 0.0))


def dice_loss(pred, target, smooth=1e-6, *, max_tile_rows=None):
    """JAX/Pallas equivalent of DiceLoss.forward(pred, target)."""
    p_flat = jnp.reshape(pred, (-1,))
    t_flat = jnp.reshape(target, (-1,))
    n = p_flat.shape[0]

    rows = n // LANES           # 128-aligned prefix handled by the kernel
    n_main = rows * LANES       # tail (< 128 elements) folded in the wrapper

    if rows == 0:               # tiny input: no kernel needed
        p32 = p_flat.astype(jnp.float32)
        t32 = t_flat.astype(jnp.float32)
        inter = jnp.sum(p32 * t32)
        denom = jnp.sum(p32) + jnp.sum(t32)
        return 1.0 - (2.0 * inter + smooth) / (denom + smooth)

    # Contiguous prefix view (no full-array jnp.pad copy).
    p_main = p_flat if n_main == n else p_flat[:n_main]
    t_main = t_flat if n_main == n else t_flat[:n_main]
    p2 = p_main.reshape(rows, LANES)
    t2 = t_main.reshape(rows, LANES)

    # Size the block in bytes so bf16/int8 inputs keep ~4 MiB DMA chunks per block.
    itemsize = max(p2.dtype.itemsize, t2.dtype.itemsize)
    tile_rows = TARGET_BLOCK_BYTES // (LANES * itemsize)
    if max_tile_rows is not None:
        tile_rows = min(tile_rows, int(max_tile_rows))
    tile_rows = min(tile_rows, _round_up(rows, SUBLANES))
    tile_rows = max(SUBLANES, (tile_rows // SUBLANES) * SUBLANES)

    acc_rows = math.gcd(tile_rows, MAX_ACC_ROWS)   # divides tile_rows, multiple of 8
    blocks_total = pl.cdiv(rows, tile_rows)
    full_blocks = rows // tile_rows                # blocks needing no masking at all
    num_cores = 2 if blocks_total >= 2 else 1      # v7x: one shard per TensorCore
    blocks_per_core = pl.cdiv(blocks_total, num_cores)
    any_masked = num_cores * blocks_per_core > full_blocks

    def in_map(c, i):
        gb = c * blocks_per_core + i
        # Clamp overflow steps (odd block counts) onto the last real block; their
        # contribution is masked to zero in-kernel via the unclamped index `gb`.
        return (jnp.minimum(gb, blocks_total - 1), 0)

    kernel = functools.partial(
        _dice_kernel,
        tile_rows=tile_rows,
        valid_rows=rows,
        blocks_per_core=blocks_per_core,
        full_blocks=full_blocks,
        acc_rows=acc_rows,
        any_masked=any_masked,
    )

    bytes_in = n_main * (p2.dtype.itemsize + t2.dtype.itemsize)
    bytes_out = 2 * num_cores * acc_rows * LANES * 4
    cost = pl.CostEstimate(flops=4 * n_main, transcendentals=0,
                           bytes_accessed=bytes_in + bytes_out)

    part_shape = jax.ShapeDtypeStruct((num_cores, acc_rows, LANES), jnp.float32)
    inter_part, sum_part = pl.pallas_call(
        kernel,
        out_shape=(part_shape, part_shape),
        grid_spec=pltpu.PrefetchScalarGridSpec(
            num_scalar_prefetch=0,
            grid=(num_cores, blocks_per_core),
            in_specs=[
                pl.BlockSpec((tile_rows, LANES), in_map),
                pl.BlockSpec((tile_rows, LANES), in_map),
            ],
            out_specs=[
                pl.BlockSpec((None, acc_rows, LANES), lambda c, i: (c, 0, 0)),
                pl.BlockSpec((None, acc_rows, LANES), lambda c, i: (c, 0, 0)),
            ],
        ),
        compiler_params=pltpu.CompilerParams(
            dimension_semantics=("parallel", "arbitrary"),
            vmem_limit_bytes=VMEM_LIMIT_BYTES,
        ),
        cost_estimate=cost,
    )(p2, t2)

    inter = jnp.sum(inter_part)
    denom = jnp.sum(sum_part)

    if n_main != n:  # fold the <128-element tail with a plain reduce
        p_tail = p_flat[n_main:].astype(jnp.float32)
        t_tail = t_flat[n_main:].astype(jnp.float32)
        inter = inter + jnp.sum(p_tail * t_tail)
        denom = denom + jnp.sum(p_tail) + jnp.sum(t_tail)

    dice = (2.0 * inter + smooth) / (denom + smooth)
    return 1.0 - dice


def dice_loss_ref(pred, target, smooth=1e-6):
    p = jnp.reshape(pred, (-1,)).astype(jnp.float32)
    t = jnp.reshape(target, (-1,)).astype(jnp.float32)
    inter = jnp.sum(p * t)
    dice = (2.0 * inter + smooth) / (jnp.sum(p) + jnp.sum(t) + smooth)
    return 1.0 - dice


if __name__ == "__main__":
    key = jax.random.PRNGKey(0)
    k1, k2, k3, k4 = jax.random.split(key, 4)

    # Small NCHW case: batch=2, channels=4, spatial=16x16 (128-aligned, single block).
    pred = jax.nn.sigmoid(jax.random.normal(k1, (2, 4, 16, 16), dtype=jnp.float32))
    target = (jax.random.uniform(k2, (2, 4, 16, 16)) > 0.5).astype(jnp.float32)
    loss = jax.block_until_ready(dice_loss(pred, target))
    ref = jax.block_until_ready(dice_loss_ref(pred, target))
    assert jnp.allclose(loss, ref, atol=1e-5, rtol=1e-5), (loss, ref)

    # Ragged case: non-multiple-of-128 element count, multi-step grid, 2-core split,
    # clamped overflow step and in-kernel masking all exercised (max_tile_rows=16).
    pred2 = jax.nn.sigmoid(jax.random.normal(k3, (1, 3, 50, 60), dtype=jnp.float32))
    target2 = (jax.random.uniform(k4, (1, 3, 50, 60)) > 0.5).astype(jnp.float32)
    loss2 = jax.block_until_ready(dice_loss(pred2, target2, max_tile_rows=16))
    ref2 = jax.block_until_ready(dice_loss_ref(pred2, target2))
    assert jnp.allclose(loss2, ref2, atol=1e-5, rtol=1e-5), (loss2, ref2)

    print("KERNEL_OK")
</pallas_src>

<mosaic_0001>
module attributes {stable_mosaic.version = 11 : i64} {
  func.func @_dice_kernel(%arg0: i32, %arg1: i32, %arg2: memref<16x128xf32, #tpu.memory_space<vmem>>, %arg3: memref<16x128xf32, #tpu.memory_space<vmem>>, %arg4: memref<1x16x128xf32, #tpu.memory_space<vmem>>, %arg5: memref<1x16x128xf32, #tpu.memory_space<vmem>>) attributes {dimension_semantics = [#tpu.dimension_semantics<parallel>, #tpu.dimension_semantics<arbitrary>], iteration_bounds = array<i64: 1, 1>, scalar_prefetch = 0 : i64, scratch_operands = 0 : i64, tpu.core_type = #tpu.core_type<tc>, window_params = [{transform_indices = @transform_0, window_bounds = array<i64: 16, 128>}, {transform_indices = @transform_1, window_bounds = array<i64: 16, 128>}, {transform_indices = @transform_2, window_bounds = array<i64: 1, 16, 128>}, {transform_indices = @transform_3, window_bounds = array<i64: 1, 16, 128>}]} {
    %c0_i32 = arith.constant 0 : i32
    %0 = arith.cmpi eq, %arg1, %c0_i32 : i32
    %1 = arith.extui %0 : i1 to i32
    %c0_i32_0 = arith.constant 0 : i32
    %2 = arith.cmpi ne, %1, %c0_i32_0 : i32
    scf.if %2 {
      %cst_17 = arith.constant 0.000000e+00 : f32
      %23 = vector.broadcast %cst_17 : f32 to vector<16x128xf32>
      %c0_18 = arith.constant 0 : index
      %c0_19 = arith.constant 0 : index
      %c0_20 = arith.constant 0 : index
      %24 = vector.load %arg4[%c0_18, %c0_19, %c0_20] : memref<1x16x128xf32, #tpu.memory_space<vmem>>, vector<1x16x128xf32>
      %25 = vector.shape_cast %24 : vector<1x16x128xf32> to vector<16x128xf32>
      %26 = vector.shape_cast %23 : vector<16x128xf32> to vector<1x16x128xf32>
      tpu.vector_store %arg4[%c0_18, %c0_19, %c0_20], %26 {strides = array<i32>} : memref<1x16x128xf32, #tpu.memory_space<vmem>>, vector<1x16x128xf32>,
      %cst_21 = arith.constant 0.000000e+00 : f32
      %27 = vector.broadcast %cst_21 : f32 to vector<16x128xf32>
      %c0_22 = arith.constant 0 : index
      %c0_23 = arith.constant 0 : index
      %c0_24 = arith.constant 0 : index
      %28 = vector.load %arg5[%c0_22, %c0_23, %c0_24] : memref<1x16x128xf32, #tpu.memory_space<vmem>>, vector<1x16x128xf32>
      %29 = vector.shape_cast %28 : vector<1x16x128xf32> to vector<16x128xf32>
      %30 = vector.shape_cast %27 : vector<16x128xf32> to vector<1x16x128xf32>
      tpu.vector_store %arg5[%c0_22, %c0_23, %c0_24], %30 {strides = array<i32>} : memref<1x16x128xf32, #tpu.memory_space<vmem>>, vector<1x16x128xf32>,
    } else {
    }
    %c0 = arith.constant 0 : index
    %c0_1 = arith.constant 0 : index
    %3 = vector.load %arg2[%c0, %c0_1] : memref<16x128xf32, #tpu.memory_space<vmem>>, vector<16x128xf32>
    %c0_2 = arith.constant 0 : index
    %c0_3 = arith.constant 0 : index
    %4 = vector.load %arg3[%c0_2, %c0_3] : memref<16x128xf32, #tpu.memory_space<vmem>>, vector<16x128xf32>
    %c0_4 = arith.constant 0 : index
    %c0_5 = arith.constant 0 : index
    %c0_6 = arith.constant 0 : index
    %5 = vector.load %arg4[%c0_4, %c0_5, %c0_6] : memref<1x16x128xf32, #tpu.memory_space<vmem>>, vector<1x16x128xf32>
    %6 = vector.shape_cast %5 : vector<1x16x128xf32> to vector<16x128xf32>
    %7 = arith.mulf %3, %4 : vector<16x128xf32>
    %8 = vector.shape_cast %7 : vector<16x128xf32> to vector<1x16x128xf32>
    %cst = arith.constant dense<0.000000e+00> : vector<16x128xf32>
    %9 = vector.multi_reduction <add>, %8, %cst [0] : vector<1x16x128xf32> to vector<16x128xf32>
    %10 = arith.addf %6, %9 : vector<16x128xf32>
    %c0_7 = arith.constant 0 : index
    %c0_8 = arith.constant 0 : index
    %c0_9 = arith.constant 0 : index
    %11 = vector.load %arg4[%c0_7, %c0_8, %c0_9] : memref<1x16x128xf32, #tpu.memory_space<vmem>>, vector<1x16x128xf32>
    %12 = vector.shape_cast %11 : vector<1x16x128xf32> to vector<16x128xf32>
    %13 = vector.shape_cast %10 : vector<16x128xf32> to vector<1x16x128xf32>
    tpu.vector_store %arg4[%c0_7, %c0_8, %c0_9], %13 {strides = array<i32>} : memref<1x16x128xf32, #tpu.memory_space<vmem>>, vector<1x16x128xf32>,
    %c0_10 = arith.constant 0 : index
    %c0_11 = arith.constant 0 : index
    %c0_12 = arith.constant 0 : index
    %14 = vector.load %arg5[%c0_10, %c0_11, %c0_12] : memref<1x16x128xf32, #tpu.memory_space<vmem>>, vector<1x16x128xf32>
    %15 = vector.shape_cast %14 : vector<1x16x128xf32> to vector<16x128xf32>
    %16 = arith.addf %3, %4 : vector<16x128xf32>
    %17 = vector.shape_cast %16 : vector<16x128xf32> to vector<1x16x128xf32>
    %cst_13 = arith.constant dense<0.000000e+00> : vector<16x128xf32>
    %18 = vector.multi_reduction <add>, %17, %cst_13 [0] : vector<1x16x128xf32> to vector<16x128xf32>
    %19 = arith.addf %15, %18 : vector<16x128xf32>
    %c0_14 = arith.constant 0 : index
    %c0_15 = arith.constant 0 : index
    %c0_16 = arith.constant 0 : index
    %20 = vector.load %arg5[%c0_14, %c0_15, %c0_16] : memref<1x16x128xf32, #tpu.memory_space<vmem>>, vector<1x16x128xf32>
    %21 = vector.shape_cast %20 : vector<1x16x128xf32> to vector<16x128xf32>
    %22 = vector.shape_cast %19 : vector<16x128xf32> to vector<1x16x128xf32>
    tpu.vector_store %arg5[%c0_14, %c0_15, %c0_16], %22 {strides = array<i32>} : memref<1x16x128xf32, #tpu.memory_space<vmem>>, vector<1x16x128xf32>,
    return
  }
  func.func @transform_0(%arg0: i32, %arg1: i32) -> (i32, i32) {
    %c1_i32 = arith.constant 1 : i32
    %0 = arith.muli %arg0, %c1_i32 : i32
    %1 = arith.addi %0, %arg1 : i32
    %c0_i32 = arith.constant 0 : i32
    %2 = arith.minsi %1, %c0_i32 : i32
    %c0_i32_0 = arith.constant 0 : i32
    %c0_i32_1 = arith.constant 0 : i32
    return %2, %c0_i32_0 : i32, i32
  }
  func.func @transform_1(%arg0: i32, %arg1: i32) -> (i32, i32) {
    %c1_i32 = arith.constant 1 : i32
    %0 = arith.muli %arg0, %c1_i32 : i32
    %1 = arith.addi %0, %arg1 : i32
    %c0_i32 = arith.constant 0 : i32
    %2 = arith.minsi %1, %c0_i32 : i32
    %c0_i32_0 = arith.constant 0 : i32
    %c0_i32_1 = arith.constant 0 : i32
    return %2, %c0_i32_0 : i32, i32
  }
  func.func @transform_2(%arg0: i32, %arg1: i32) -> (i32, i32, i32) {
    %c0_i32 = arith.constant 0 : i32
    %c0_i32_0 = arith.constant 0 : i32
    %c0_i32_1 = arith.constant 0 : i32
    return %arg0, %c0_i32, %c0_i32_0 : i32, i32, i32
  }
  func.func @transform_3(%arg0: i32, %arg1: i32) -> (i32, i32, i32) {
    %c0_i32 = arith.constant 0 : i32
    %c0_i32_0 = arith.constant 0 : i32
    %c0_i32_1 = arith.constant 0 : i32
    return %arg0, %c0_i32, %c0_i32_0 : i32, i32, i32
  }
}

</mosaic_0001>

<bundles_post_ra>
// kernel: tpu_custom_call.1
= control target key start
LH: loop header
LB: loop body
LE: loop exit
PB: predicated region body
PF: predicated region fallthrough
CT: control target
= control target key end

     0   :  { %9 = vsyncpa [#allocation3], 0  ;;  %s278_s0 = inlined_call_operand.hbm [shape: f32[16,128], index: 0, kind: input, shape index: {}]   ;;  %s279_s1 = inlined_call_operand.hbm [shape: f32[16,128], index: 1, kind: input, shape index: {}]   ;;  %s280_s2 = inlined_call_operand.hbm [shape: f32[1,16,128], index: 2, kind: output, shape index: {0}]   ;;  %s281_s3 = inlined_call_operand.hbm [shape: f32[1,16,128], index: 3, kind: output, shape index: {1}]  }
   0x1   :  { %10 = vsyncpa [#allocation6], 0 }
   0x2   :  { %11 = vsyncpa [#allocation4], 0 }
   0x3   :  { %12 = vsyncpa [#allocation9], 0  ;;  %s228_s12 = smov [#allocation2]  }
   0x4   :  { %s24_s13 = sshll.u32 %s228_s12, 4  ;;  %s25_s13 = int_to_ptr.vmem [resolvable:$true] %s24_s13 }
   0x5   :  { %s148_s14 = scalar_lea.vmem %s25_s13, 256  ;;  %p153_p1 = scmp.lt.s32.totalorder %s25_s13, %s25_s13 }
   0x6   :  { %p149_p0 = scmp.ne.s32.totalorder %s25_s13, %s148_s14  ;;  %p154_p2 = scmp.lt.s32.totalorder %s148_s14, %s148_s14 }
   0x8   :  { %p155_p3 = por %p154_p2, %p153_p1 }
   0xa   :  { %p156_p4 = pnand %p155_p3, %p149_p0 }
   0xc   :  { %159 = shalt.err (!%p156_p4)
}
   0xd   :  { %s229_s15 = smov 128   ;;  %s230_s16 = smov 8  }
   0xe   :  { %30 = dma.hbm_to_vmem [thread:$0]  %s278_s0, 256, %s25_s13, [#allocation3], %s229_s15, %s229_s15, %s230_s16  }
   0xf   :  { %s231_s19 = smov [#allocation5]  }
  0x10   :  { %s42_s20 = sshll.u32 %s231_s19, 4  ;;  %s43_s20 = int_to_ptr.vmem [resolvable:$true] %s42_s20 }
  0x11   :  { %s168_s21 = scalar_lea.vmem %s43_s20, 256  ;;  %p173_p6 = scmp.lt.s32.totalorder %s43_s20, %s43_s20 }
  0x12   :  { %p169_p5 = scmp.ne.s32.totalorder %s43_s20, %s168_s21  ;;  %p174_p7 = scmp.lt.s32.totalorder %s168_s21, %s168_s21 }
  0x14   :  { %p175_p8 = por %p174_p7, %p173_p6 }
  0x16   :  { %p176_p9 = pnand %p175_p8, %p169_p5 }
  0x18   :  { %179 = shalt.err (!%p176_p9)
}
  0x19   :  { %48 = dma.hbm_to_vmem [thread:$0]  %s279_s1, 256, %s43_s20, [#allocation6], %s229_s15, %s229_s15, %s230_s16  }
  0x1a   :  { %220 = dma.done.wait [#allocation3], 256  }
  0x1b   :  { %221 = vsyncadd [#allocation3], 4294967040 }
  0x1c   :  { %222 = dma.done.wait [#allocation6], 256  }
  0x1d   :  { %223 = vsyncadd [#allocation6], 4294967040  ;;  %v71_v0 = vld [vmem:[#allocation2] sm:$0xff]  ;;  %v73_v1 = vld [vmem:[#allocation5] sm:$0xff]  ;;  %s232_s0 = smov [#allocation7]   ;;  %s233_s25 = smov [#allocation8]  }
  0x1e   :  { %v72_v2 = vld [vmem:[#allocation2 + $0x8] sm:$0xff]  ;;  %v77_v3 = vmul.f32 %v73_v1, %v71_v0  ;;  %v74_v4 = vld [vmem:[#allocation5 + $0x8] sm:$0xff]  ;;  %v87_v5 = vadd.f32 %v73_v1, %v71_v0  ;;  %s100_s24 = sshll.u32 %s232_s0, 4  ;;  %s112_s26 = sshll.u32 %s233_s25, 4  ;;  %s101_s24 = int_to_ptr.vmem [resolvable:$true] %s100_s24  ;;  %s113_s26 = int_to_ptr.vmem [resolvable:$true] %s112_s26 }
  0x1f   :  { %v78_v6 = vmul.f32 %v74_v4, %v72_v2  ;;  %v88_v7 = vadd.f32 %v74_v4, %v72_v2  ;;  %s180_s1 = scalar_lea.vmem %s101_s24, 256  ;;  %p185_p11 = scmp.lt.s32.totalorder %s101_s24, %s101_s24 }
  0x20   :  { %83 = vst [vmem:[#allocation7] sm:$0xff] %v77_v3  ;;  %93 = vst [vmem:[#allocation8] sm:$0xff] %v87_v5  ;;  %p181_p10 = scmp.ne.s32.totalorder %s101_s24, %s180_s1  ;;  %p186_p12 = scmp.lt.s32.totalorder %s180_s1, %s180_s1 }
  0x21   :  { %84 = vst [vmem:[#allocation7 + $0x8] sm:$0xff] %v78_v6  ;;  %94 = vst [vmem:[#allocation8 + $0x8] sm:$0xff] %v88_v7 }
  0x22   :  { %p187_p13 = por %p186_p12, %p185_p11 }
  0x24   :  { %p188_p0 = pnand %p187_p13, %p181_p10 }
  0x26   :  { %191 = shalt.err (!%p188_p0)
}
  0x27   :  { %106 = dma.vmem_to_hbm [thread:$0]  %s101_s24, 256, %s280_s2, [#allocation4], %s229_s15, %s229_s15, %s230_s16  }
  0x28   :  { %s200_s29 = scalar_lea.vmem %s113_s26, 256  ;;  %p205_p2 = scmp.lt.s32.totalorder %s113_s26, %s113_s26 }
  0x29   :  { %p201_p1 = scmp.ne.s32.totalorder %s113_s26, %s200_s29  ;;  %p206_p3 = scmp.lt.s32.totalorder %s200_s29, %s200_s29 }
  0x2b   :  { %p207_p4 = por %p206_p3, %p205_p2 }
  0x2d   :  { %p208_p5 = pnand %p207_p4, %p201_p1 }
  0x2f   :  { %211 = shalt.err (!%p208_p5)
}
  0x30   :  { %118 = dma.vmem_to_hbm [thread:$0]  %s113_s26, 256, %s281_s3, [#allocation9], %s229_s15, %s229_s15, %s230_s16  }
  0x31   :  { %224 = dma.done.wait [#allocation4], 256  }
  0x32   :  { %225 = vsyncadd [#allocation4], 4294967040 }
  0x33   :  { %226 = dma.done.wait [#allocation9], 256  }
  0x34   :  { %227 = vsyncadd [#allocation9], 4294967040 }
  0x35   :  { %125 = vsyncpa [#allocation3], 1 }
  0x36   :  { %126 = vsyncpa [#allocation6], 1 }
  0x37   :  { %127 = vsyncpa [#allocation4], 1 }
  0x38   :  { %128 = vsyncpa [#allocation9], 1 }

</bundles_post_ra>
